<compile_context>
chip_gen: v5e
topology: v5e:2x2
jax: 0.10.0
libtpu: 0.0.40
codegen_flags: <defaults>
</compile_context>

<pallas_src>
import functools
import math

import jax
import jax.numpy as jnp
from jax.experimental import pallas as pl
from jax.experimental.pallas import tpu as pltpu


def _round_up(n, m):
    return ((n + m - 1) // m) * m


def _cdiv(a, b):
    return -(-a // b)


def _mlp_kernel(x_ref, w_ref, b_ref, o_ref, *, num_relu_layers, out_size):
    """One batch tile of the whole MLP.

    x_ref: (bt, d_in)            row-major activation tile (contiguous DMA)
    w_ref: (L, d_pad, d_in_pad)  packed weights, torch (out, in) layout
    b_ref: (L, d_pad, 1)         packed biases (always f32)
    o_ref: (out_size, bt)        lane-dense output (batch on lanes)
    """
    w = w_ref[...]   # whole param slab (~6 KB), resident across grid steps
    b = b_ref[...]   # f32

    # Put the batch on the lane axis: (bt, d_in) -> (d_in, bt).
    # Transpose rides the XLU slot, which is otherwise idle in this kernel.
    h = x_ref[...].astype(jnp.float32).T.astype(w.dtype)

    # Hidden stack: Linear + ReLU (input layer + hidden_count layers), static unroll.
    for i in range(num_relu_layers):
        z = jnp.dot(w[i], h, preferred_element_type=jnp.float32) + b[i]
        h = jnp.maximum(z, 0.0).astype(w.dtype)

    # Output layer: rows >= out_size are zero-padding and are never stored.
    z = jnp.dot(w[num_relu_layers], h, preferred_element_type=jnp.float32) \
        + b[num_relu_layers]
    o_ref[...] = jax.nn.sigmoid(z[:out_size, :]).astype(o_ref.dtype)


def neuralistica_forward(x, w_stack, b_stack, out_size, *,
                         block_b=16384, use_bf16=False):
    """x: (batch, in_features) f32. w_stack: (L, d_pad, d_in) torch (out,in) layout.
    b_stack: (L, d_pad, 1) f32. Returns (batch, out_size) f32."""
    assert block_b % 128 == 0, "block_b must be a multiple of the 128-lane width"
    batch, in_size = x.shape
    n_layers, d_pad, d_in_pad = w_stack.shape

    # Adaptive batch tiling: big tiles to amortize per-grid-step overhead, but at
    # least 2 tiles (when batch allows) so v7x can shard across its 2 TensorCores.
    n_tiles = max(1, _cdiv(batch, block_b))
    if n_tiles == 1 and batch >= 256:
        n_tiles = 2
    bt = _round_up(_cdiv(batch, n_tiles), 128)
    padded = bt * n_tiles

    # Only pad the batch axis if needed (row-major pad; no transpose in the wrapper).
    x_in = x if padded == batch else jnp.pad(x, ((0, padded - batch), (0, 0)))

    if use_bf16:
        # Halves streamed HBM bytes & uses the native bf16 MXU path; f32 accumulate.
        x_in = x_in.astype(jnp.bfloat16)
        w_in = w_stack.astype(jnp.bfloat16)
    else:
        w_in = w_stack

    kernel = functools.partial(
        _mlp_kernel, num_relu_layers=n_layers - 1, out_size=out_size)

    cost = pl.CostEstimate(
        flops=2 * padded * d_pad * d_in_pad * n_layers,
        transcendentals=padded * out_size,
        bytes_accessed=(x_in.size * x_in.dtype.itemsize
                        + w_in.size * w_in.dtype.itemsize
                        + b_stack.size * b_stack.dtype.itemsize
                        + out_size * padded * 4),
    )

    out_t = pl.pallas_call(
        kernel,
        out_shape=jax.ShapeDtypeStruct((out_size, padded), jnp.float32),
        grid=(n_tiles,),
        in_specs=[
            pl.BlockSpec((bt, in_size), lambda i: (i, 0)),            # streamed x tile
            pl.BlockSpec(tuple(w_in.shape), lambda i: (0, 0, 0)),     # resident weights
            pl.BlockSpec(tuple(b_stack.shape), lambda i: (0, 0, 0)),  # resident biases
        ],
        out_specs=pl.BlockSpec((out_size, bt), lambda i: (0, i)),
        compiler_params=pltpu.CompilerParams(
            dimension_semantics=("parallel",),
            vmem_limit_bytes=32 * 1024 * 1024),
        cost_estimate=cost,
    )(x_in, w_in, b_stack)

    # (out_size, padded) -> (batch, out_size); tiny (3 x batch) transpose.
    return out_t[:, :batch].T


def init_params(key, input_size=16, output_size=3, hidden_size=16, hidden_count=4):
    """Torch-layout params: W (out, in), b (out,), U[-1/sqrt(fan_in), +1/sqrt(fan_in)]."""
    dims = [(hidden_size, input_size)]
    dims += [(hidden_size, hidden_size)] * hidden_count
    dims += [(output_size, hidden_size)]

    params = []
    for (fan_out, fan_in) in dims:
        key, kw, kb = jax.random.split(key, 3)
        bound = 1.0 / math.sqrt(fan_in)
        w = jax.random.uniform(kw, (fan_out, fan_in), jnp.float32, -bound, bound)
        b = jax.random.uniform(kb, (fan_out,), jnp.float32, -bound, bound)
        params.append((w, b))
    return params


def pack_params(params):
    """Stack torch-layout (W, b) pairs into two zero-padded slabs."""
    n = len(params)
    d_out = max(w.shape[0] for w, _ in params)
    d_in = max(w.shape[1] for w, _ in params)
    w_stack = jnp.zeros((n, d_out, d_in), jnp.float32)
    b_stack = jnp.zeros((n, d_out, 1), jnp.float32)
    for i, (w, b) in enumerate(params):
        w_stack = w_stack.at[i, :w.shape[0], :w.shape[1]].set(w)
        b_stack = b_stack.at[i, :b.shape[0], 0].set(b)
    return w_stack, b_stack


def reference_forward(x, params):
    """Pure-JAX reference of the same forward pass (torch-layout params)."""
    h = x
    for w, b in params[:-1]:
        h = jnp.maximum(h @ w.T + b, 0.0)
    w, b = params[-1]
    return jax.nn.sigmoid(h @ w.T + b)


if __name__ == "__main__":
    key = jax.random.PRNGKey(0)
    key, kx1, kx2 = jax.random.split(key, 3)

    input_size, output_size, hidden_size, hidden_count = 16, 3, 16, 4
    params = init_params(key, input_size, output_size, hidden_size, hidden_count)
    w_stack, b_stack = pack_params(params)

    # Small case (single tile, batch padded 8 -> 128).
    batch = 8
    x = jax.random.normal(kx1, (batch, input_size), jnp.float32)
    out = jax.block_until_ready(
        neuralistica_forward(x, w_stack, b_stack, output_size))
    ref = reference_forward(x, params)
    assert out.shape == (batch, output_size)
    assert jnp.allclose(out, ref, atol=1e-5, rtol=1e-5)

    # Multi-tile case (exercises the 2-tile grid + batch-pad slicing path).
    batch2 = 1000
    x2 = jax.random.normal(kx2, (batch2, input_size), jnp.float32)
    out2 = jax.block_until_ready(
        neuralistica_forward(x2, w_stack, b_stack, output_size))
    ref2 = reference_forward(x2, params)
    assert out2.shape == (batch2, output_size)
    assert jnp.allclose(out2, ref2, atol=1e-5, rtol=1e-5)

    print("KERNEL_OK")
</pallas_src>

<mosaic_0001>
module attributes {stable_mosaic.version = 11 : i64} {
  func.func @_mlp_kernel(%arg0: i32, %arg1: memref<128x16xf32, #tpu.memory_space<vmem>>, %arg2: memref<6x16x16xf32, #tpu.memory_space<vmem>>, %arg3: memref<6x16x1xf32, #tpu.memory_space<vmem>>, %arg4: memref<3x128xf32, #tpu.memory_space<vmem>>) attributes {dimension_semantics = [#tpu.dimension_semantics<parallel>], iteration_bounds = array<i64: 1>, scalar_prefetch = 0 : i64, scratch_operands = 0 : i64, tpu.core_type = #tpu.core_type<tc>, window_params = [{transform_indices = @transform_0, window_bounds = array<i64: 128, 16>}, {pipeline_mode = #tpu.pipeline_mode<synchronous>, transform_indices = @transform_1, window_bounds = array<i64: 6, 16, 16>}, {pipeline_mode = #tpu.pipeline_mode<synchronous>, transform_indices = @transform_2, window_bounds = array<i64: 6, 16, 1>}, {transform_indices = @transform_3, window_bounds = array<i64: 3, 128>}]} {
    %c0 = arith.constant 0 : index
    %c0_0 = arith.constant 0 : index
    %c0_1 = arith.constant 0 : index
    %0 = vector.load %arg2[%c0, %c0_0, %c0_1] : memref<6x16x16xf32, #tpu.memory_space<vmem>>, vector<6x16x16xf32>
    %c0_2 = arith.constant 0 : index
    %c0_3 = arith.constant 0 : index
    %c0_4 = arith.constant 0 : index
    %1 = vector.load %arg3[%c0_2, %c0_3, %c0_4] : memref<6x16x1xf32, #tpu.memory_space<vmem>>, vector<6x16x1xf32>
    %c0_5 = arith.constant 0 : index
    %c0_6 = arith.constant 0 : index
    %2 = vector.load %arg1[%c0_5, %c0_6] : memref<128x16xf32, #tpu.memory_space<vmem>>, vector<128x16xf32>
    %3 = tpu.transpose %2, [1, 0] : vector<128x16xf32> -> vector<16x128xf32>
    %4 = vector.extract_strided_slice %0 {offsets = [0, 0, 0], sizes = [1, 16, 16], strides = [1, 1, 1]} : vector<6x16x16xf32> to vector<1x16x16xf32>
    %5 = vector.shape_cast %4 : vector<1x16x16xf32> to vector<16x16xf32>
    %cst = arith.constant dense<0.000000e+00> : vector<16x128xf32>
    %6 = tpu.matmul %5, %3, %cst {dimension_numbers = #tpu.dot_dimension_numbers<[1], [0], [0], [1], [0, 0, 1, 1], [], []>} : vector<16x16xf32>, vector<16x128xf32>, vector<16x128xf32> -> vector<16x128xf32>
    %7 = vector.extract_strided_slice %1 {offsets = [0, 0, 0], sizes = [1, 16, 1], strides = [1, 1, 1]} : vector<6x16x1xf32> to vector<1x16x1xf32>
    %8 = vector.shape_cast %7 : vector<1x16x1xf32> to vector<16x1xf32>
    %9 = vector.broadcast %8 : vector<16x1xf32> to vector<16x128xf32>
    %10 = arith.addf %6, %9 : vector<16x128xf32>
    %cst_7 = arith.constant 0.000000e+00 : f32
    %11 = vector.broadcast %cst_7 : f32 to vector<16x128xf32>
    %12 = arith.maximumf %10, %11 : vector<16x128xf32>
    %13 = vector.extract_strided_slice %0 {offsets = [1, 0, 0], sizes = [1, 16, 16], strides = [1, 1, 1]} : vector<6x16x16xf32> to vector<1x16x16xf32>
    %14 = vector.shape_cast %13 : vector<1x16x16xf32> to vector<16x16xf32>
    %cst_8 = arith.constant dense<0.000000e+00> : vector<16x128xf32>
    %15 = tpu.matmul %14, %12, %cst_8 {dimension_numbers = #tpu.dot_dimension_numbers<[1], [0], [0], [1], [0, 0, 1, 1], [], []>} : vector<16x16xf32>, vector<16x128xf32>, vector<16x128xf32> -> vector<16x128xf32>
    %16 = vector.extract_strided_slice %1 {offsets = [1, 0, 0], sizes = [1, 16, 1], strides = [1, 1, 1]} : vector<6x16x1xf32> to vector<1x16x1xf32>
    %17 = vector.shape_cast %16 : vector<1x16x1xf32> to vector<16x1xf32>
    %18 = vector.broadcast %17 : vector<16x1xf32> to vector<16x128xf32>
    %19 = arith.addf %15, %18 : vector<16x128xf32>
    %cst_9 = arith.constant 0.000000e+00 : f32
    %20 = vector.broadcast %cst_9 : f32 to vector<16x128xf32>
    %21 = arith.maximumf %19, %20 : vector<16x128xf32>
    %22 = vector.extract_strided_slice %0 {offsets = [2, 0, 0], sizes = [1, 16, 16], strides = [1, 1, 1]} : vector<6x16x16xf32> to vector<1x16x16xf32>
    %23 = vector.shape_cast %22 : vector<1x16x16xf32> to vector<16x16xf32>
    %cst_10 = arith.constant dense<0.000000e+00> : vector<16x128xf32>
    %24 = tpu.matmul %23, %21, %cst_10 {dimension_numbers = #tpu.dot_dimension_numbers<[1], [0], [0], [1], [0, 0, 1, 1], [], []>} : vector<16x16xf32>, vector<16x128xf32>, vector<16x128xf32> -> vector<16x128xf32>
    %25 = vector.extract_strided_slice %1 {offsets = [2, 0, 0], sizes = [1, 16, 1], strides = [1, 1, 1]} : vector<6x16x1xf32> to vector<1x16x1xf32>
    %26 = vector.shape_cast %25 : vector<1x16x1xf32> to vector<16x1xf32>
    %27 = vector.broadcast %26 : vector<16x1xf32> to vector<16x128xf32>
    %28 = arith.addf %24, %27 : vector<16x128xf32>
    %cst_11 = arith.constant 0.000000e+00 : f32
    %29 = vector.broadcast %cst_11 : f32 to vector<16x128xf32>
    %30 = arith.maximumf %28, %29 : vector<16x128xf32>
    %31 = vector.extract_strided_slice %0 {offsets = [3, 0, 0], sizes = [1, 16, 16], strides = [1, 1, 1]} : vector<6x16x16xf32> to vector<1x16x16xf32>
    %32 = vector.shape_cast %31 : vector<1x16x16xf32> to vector<16x16xf32>
    %cst_12 = arith.constant dense<0.000000e+00> : vector<16x128xf32>
    %33 = tpu.matmul %32, %30, %cst_12 {dimension_numbers = #tpu.dot_dimension_numbers<[1], [0], [0], [1], [0, 0, 1, 1], [], []>} : vector<16x16xf32>, vector<16x128xf32>, vector<16x128xf32> -> vector<16x128xf32>
    %34 = vector.extract_strided_slice %1 {offsets = [3, 0, 0], sizes = [1, 16, 1], strides = [1, 1, 1]} : vector<6x16x1xf32> to vector<1x16x1xf32>
    %35 = vector.shape_cast %34 : vector<1x16x1xf32> to vector<16x1xf32>
    %36 = vector.broadcast %35 : vector<16x1xf32> to vector<16x128xf32>
    %37 = arith.addf %33, %36 : vector<16x128xf32>
    %cst_13 = arith.constant 0.000000e+00 : f32
    %38 = vector.broadcast %cst_13 : f32 to vector<16x128xf32>
    %39 = arith.maximumf %37, %38 : vector<16x128xf32>
    %40 = vector.extract_strided_slice %0 {offsets = [4, 0, 0], sizes = [1, 16, 16], strides = [1, 1, 1]} : vector<6x16x16xf32> to vector<1x16x16xf32>
    %41 = vector.shape_cast %40 : vector<1x16x16xf32> to vector<16x16xf32>
    %cst_14 = arith.constant dense<0.000000e+00> : vector<16x128xf32>
    %42 = tpu.matmul %41, %39, %cst_14 {dimension_numbers = #tpu.dot_dimension_numbers<[1], [0], [0], [1], [0, 0, 1, 1], [], []>} : vector<16x16xf32>, vector<16x128xf32>, vector<16x128xf32> -> vector<16x128xf32>
    %43 = vector.extract_strided_slice %1 {offsets = [4, 0, 0], sizes = [1, 16, 1], strides = [1, 1, 1]} : vector<6x16x1xf32> to vector<1x16x1xf32>
    %44 = vector.shape_cast %43 : vector<1x16x1xf32> to vector<16x1xf32>
    %45 = vector.broadcast %44 : vector<16x1xf32> to vector<16x128xf32>
    %46 = arith.addf %42, %45 : vector<16x128xf32>
    %cst_15 = arith.constant 0.000000e+00 : f32
    %47 = vector.broadcast %cst_15 : f32 to vector<16x128xf32>
    %48 = arith.maximumf %46, %47 : vector<16x128xf32>
    %49 = vector.extract_strided_slice %0 {offsets = [5, 0, 0], sizes = [1, 16, 16], strides = [1, 1, 1]} : vector<6x16x16xf32> to vector<1x16x16xf32>
    %50 = vector.shape_cast %49 : vector<1x16x16xf32> to vector<16x16xf32>
    %cst_16 = arith.constant dense<0.000000e+00> : vector<16x128xf32>
    %51 = tpu.matmul %50, %48, %cst_16 {dimension_numbers = #tpu.dot_dimension_numbers<[1], [0], [0], [1], [0, 0, 1, 1], [], []>} : vector<16x16xf32>, vector<16x128xf32>, vector<16x128xf32> -> vector<16x128xf32>
    %52 = vector.extract_strided_slice %1 {offsets = [5, 0, 0], sizes = [1, 16, 1], strides = [1, 1, 1]} : vector<6x16x1xf32> to vector<1x16x1xf32>
    %53 = vector.shape_cast %52 : vector<1x16x1xf32> to vector<16x1xf32>
    %54 = vector.broadcast %53 : vector<16x1xf32> to vector<16x128xf32>
    %55 = arith.addf %51, %54 : vector<16x128xf32>
    %56 = vector.extract_strided_slice %55 {offsets = [0, 0], sizes = [3, 128], strides = [1, 1]} : vector<16x128xf32> to vector<3x128xf32>
    %57 = arith.negf %56 : vector<3x128xf32>
    %58 = math.exp %57 : vector<3x128xf32>
    %cst_17 = arith.constant 1.000000e+00 : f32
    %59 = vector.broadcast %cst_17 : f32 to vector<3x128xf32>
    %60 = arith.addf %59, %58 : vector<3x128xf32>
    %61 = arith.divf %59, %60 : vector<3x128xf32>
    %c0_18 = arith.constant 0 : index
    %c0_19 = arith.constant 0 : index
    %62 = vector.load %arg4[%c0_18, %c0_19] : memref<3x128xf32, #tpu.memory_space<vmem>>, vector<3x128xf32>
    tpu.vector_store %arg4[%c0_18, %c0_19], %61 {strides = array<i32>} : memref<3x128xf32, #tpu.memory_space<vmem>>, vector<3x128xf32>,
    return
  }
  func.func @transform_0(%arg0: i32) -> (i32, i32) {
    %c0_i32 = arith.constant 0 : i32
    %c0_i32_0 = arith.constant 0 : i32
    return %arg0, %c0_i32 : i32, i32
  }
  func.func @transform_1(%arg0: i32) -> (i32, i32, i32) {
    %c0_i32 = arith.constant 0 : i32
    %c0_i32_0 = arith.constant 0 : i32
    %c0_i32_1 = arith.constant 0 : i32
    %c0_i32_2 = arith.constant 0 : i32
    return %c0_i32, %c0_i32_0, %c0_i32_1 : i32, i32, i32
  }
  func.func @transform_2(%arg0: i32) -> (i32, i32, i32) {
    %c0_i32 = arith.constant 0 : i32
    %c0_i32_0 = arith.constant 0 : i32
    %c0_i32_1 = arith.constant 0 : i32
    %c0_i32_2 = arith.constant 0 : i32
    return %c0_i32, %c0_i32_0, %c0_i32_1 : i32, i32, i32
  }
  func.func @transform_3(%arg0: i32) -> (i32, i32) {
    %c0_i32 = arith.constant 0 : i32
    %c0_i32_0 = arith.constant 0 : i32
    return %c0_i32, %arg0 : i32, i32
  }
}

</mosaic_0001>

<bundles_post_ra>
// kernel: tpu_custom_call.1
= control target key start
LH: loop header
LB: loop body
LE: loop exit
PB: predicated region body
PF: predicated region fallthrough
CT: control target
= control target key end

     0   :  { %vm65_vm0 = vcmask 130048   ;;  %s616_s0 = inlined_call_operand.vmem [shape: f32[128,16], index: 0, kind: input, shape index: {}]   ;;  %s617_s1 = inlined_call_operand.vmem [shape: f32[6,16,16], index: 1, kind: input, shape index: {}]   ;;  %s618_s2 = inlined_call_operand.vmem [shape: f32[6,16,1], index: 2, kind: input, shape index: {}]   ;;  %s619_s3 = inlined_call_operand.hbm [shape: f32[3,128], index: 3, kind: output, shape index: {}]  }
   0x1   :  { %v54_v0 = vld [vmem:[%s616_s0 + $0x78] sm:$0xff]  ;;  %v53_v1 = vld [vmem:[%s616_s0 + $0x70] sm:$0xff] }
   0x2   :  { %382 = vmatpush.xpose.msk.msra.mxu0 %vm65_vm0, %v54_v0 }
   0x3   :  { %8 = vsyncpa [#allocation3], 0  ;;  %v52_v2 = vld [vmem:[%s616_s0 + $0x68] sm:$0xff]  ;;  %v51_v3 = vld [vmem:[%s616_s0 + $0x60] sm:$0xff]  ;;  %v446_v6 = vmov 0   ;;  %s447_s6 = smov [#allocation2]  }
   0x4   :  { %v50_v4 = vld [vmem:[%s616_s0 + $0x58] sm:$0xff]  ;;  %v49_v5 = vld [vmem:[%s616_s0 + $0x50] sm:$0xff]  ;;  %413 = vset.pattern.permute.xlu0 %v446_v6  ;;  %414 = vset.pattern.permute.xlu1 %v446_v6  ;;  %v28_v7 = vld [vmem:[%s618_s2 + $0x8] sm:$0xff]  ;;  %s373_s9 = sshll.u32 %s619_s3, 4  ;;  %s374_s9 = int_to_ptr.hbm [resolvable:$true] %s373_s9 }
   0x5   :  { %415 = vset.pattern.permute.xlu2 %v446_v6  ;;  %62 = vperm.xlu0 %413, %v28_v7   ;;  %v48_v8 = vld [vmem:[%s616_s0 + $0x48] sm:$0xff]  ;;  %v47_v9 = vld [vmem:[%s616_s0 + $0x40] sm:$0xff]  ;;  %v46_v11 = vld [vmem:[%s616_s0 + $0x38] sm:$0xff] }
   0x6   :  { %383 = vmatpush.xpose.msk.msra.mxu0 %vm65_vm0, %v53_v1  ;;  %v27_v10 = vld [vmem:[%s618_s2] sm:$0xff]  ;;  %v45_v12 = vld [vmem:[%s616_s0 + $0x30] sm:$0xff]  ;;  %v34_v13 = vld [vmem:[%s618_s2 + $0x38] sm:$0xff] }
   0x7   :  { %v44_v14 = vld [vmem:[%s616_s0 + $0x28] sm:$0xff]  ;;  %v43_v15 = vld [vmem:[%s616_s0 + $0x20] sm:$0xff]  ;;  %v42_v17 = vld [vmem:[%s616_s0 + $0x18] sm:$0xff] }
   0x8   :  { %v35_v16 = vld [vmem:[%s618_s2 + $0x40] sm:$0xff]  ;;  %v41_v18 = vld [vmem:[%s616_s0 + $0x10] sm:$0xff]  ;;  %v40_v19 = vld [vmem:[%s616_s0 + $0x8] sm:$0xff] }
   0x9   :  { %v39_v20 = vld [vmem:[%s616_s0] sm:$0xff]  ;;  %v16_v22 = vld [vmem:[%s617_s1 + $0x8] sm:$0xff]  ;;  %v30_v23 = vld [vmem:[%s618_s2 + $0x18] sm:$0xff] }
   0xa   :  { %384 = vmatpush.xpose.msk.msra.mxu0 %vm65_vm0, %v52_v2  ;;  %v15_v21 = vld [vmem:[%s617_s1] sm:$0xff]  ;;  %152 = vperm.xlu1 %414, %v30_v23   ;;  %v29_v24 = vld [vmem:[%s618_s2 + $0x10] sm:$0xff]  ;;  %v18_v36 = vld [vmem:[%s617_s1 + $0x18] sm:$0xff] }
   0xb   :  { %v33_v25 = vld [vmem:[%s618_s2 + $0x30] sm:$0xff]  ;;  %v32_v37 = vld [vmem:[%s618_s2 + $0x28] sm:$0xff]  ;;  %v31_v39 = vld [vmem:[%s618_s2 + $0x20] sm:$0xff] }
   0xc   :  { %v37_v26 = vld [vmem:[%s618_s2 + $0x50] sm:$0xff]  ;;  %193 = vperm.xlu2 %415, %v32_v37   ;;  %v36_v41 = vld [vmem:[%s618_s2 + $0x48] sm:$0xff]  ;;  %v19_v48 = vld [vmem:[%s617_s1 + $0x20] sm:$0xff] }
   0xd   :  { %57 = vperm.xlu0 %413, %v27_v10   ;;  %v17_v35 = vld [vmem:[%s617_s1 + $0x10] sm:$0xff]  ;;  %v20_v49 = vld [vmem:[%s617_s1 + $0x28] sm:$0xff]  ;;  %v22_v59 = vld [vmem:[%s617_s1 + $0x38] sm:$0xff] }
   0xe   :  { %385 = vmatpush.xpose.msk.msra.mxu0 %vm65_vm0, %v51_v3  ;;  %v21_v58 = vld [vmem:[%s617_s1 + $0x30] sm:$0xff] }
  0x12   :  { %386 = vmatpush.xpose.msk.msra.mxu0 %vm65_vm0, %v50_v4  ;;  %147 = vperm.xlu1 %414, %v29_v24   ;;  %v23_v4 = vld [vmem:[%s617_s1 + $0x40] sm:$0xff] }
  0x14   :  { %188 = vperm.xlu2 %415, %v31_v39  }
  0x15   :  { %234 = vperm.xlu0 %413, %v34_v13  }
  0x16   :  { %387 = vmatpush.xpose.msk.msra.mxu0 %vm65_vm0, %v49_v5  ;;  %v24_v5 = vld [vmem:[%s617_s1 + $0x48] sm:$0xff] }
  0x1a   :  { %388 = vmatpush.xpose.msk.msra.mxu0 %vm65_vm0, %v48_v8  ;;  %229 = vperm.xlu1 %414, %v33_v25  }
  0x1c   :  { %275 = vperm.xlu2 %415, %v36_v41  }
  0x1d   :  { %270 = vperm.xlu0 %413, %v35_v16  }
  0x1e   :  { %389 = vmatpush.xpose.msk.msra.mxu0 %vm65_vm0, %v47_v9 }
  0x22   :  { %390 = vmatpush.xpose.msk.msra.mxu0 %vm65_vm0, %v46_v11  ;;  %311 = vperm.xlu1 %414, %v37_v26  }
  0x26   :  { %391 = vmatpush.xpose.msk.msra.mxu0 %vm65_vm0, %v45_v12 }
  0x2a   :  { %392 = vmatpush.xpose.msk.msra.mxu0 %vm65_vm0, %v44_v14  ;;  %v25_v14 = vld [vmem:[%s617_s1 + $0x50] sm:$0xff] }
  0x2e   :  { %393 = vmatpush.xpose.msk.msra.mxu0 %vm65_vm0, %v43_v15  ;;  %v26_v15 = vld [vmem:[%s617_s1 + $0x58] sm:$0xff]  ;;  %s371_s1 = sshll.u32 %s447_s6, 4  ;;  %s372_s1 = int_to_ptr.vmem [resolvable:$true] %s371_s1 }
  0x32   :  { %394 = vmatpush.xpose.msk.msra.mxu0 %vm65_vm0, %v42_v17 }
  0x36   :  { %395 = vmatpush.xpose.msk.msra.mxu0 %vm65_vm0, %v41_v18 }
  0x3a   :  { %396 = vmatpush.xpose.msk.msra.mxu0 %vm65_vm0, %v40_v19 }
  0x3e   :  { %397 = vmatpush.xpose.msk.msra.mxu0 %vm65_vm0, %v39_v20 }
  0x41   :  { %398 = vmatmul.msk.f32.vlgmr.msra.gmra.mxu0 %vm65_vm0, %v15_v21 }
  0x49   :  { %399 = vmatmul.msk.f32.gmra.mxu0 %vm65_vm0, %v16_v22 }
  0x66   :  { %v194_v50 = vpop.permute.xlu2 %193 }
  0x6e   :  { %v189_v52 = vpop.permute.xlu2 %188 }
  0x76   :  { %v276_v8 = vpop.permute.xlu2 %275 }
  0x77   :  { %v63_v27 = vpop.permute.xlu0 %62 }
  0x7c   :  { %v153_v38 = vpop.permute.xlu1 %152 }
  0x7f   :  { %v58_v29 = vpop.permute.xlu0 %57 }
  0x84   :  { %v148_v42 = vpop.permute.xlu1 %147 }
  0x87   :  { %v235_v61 = vpop.permute.xlu0 %234 }
  0x8c   :  { %v230_v62 = vpop.permute.xlu1 %229 }
  0x8f   :  { %v271_v7 = vpop.permute.xlu0 %270 }
  0x94   :  { %v312_v16 = vpop.permute.xlu1 %311 }
  0xbe   :  { %v137_v28 = vpop.f32.mrf.mxu0 }
  0xbf   :  { %v138_v31 = vadd.f32 %v137_v28, %v58_v29 }
  0xc1   :  { %v143_v34 = vmax.f32 %v138_v31, 0.0 }
  0xc6   :  { %v140_v30 = vpop.f32.mrf.mxu0 }
  0xc7   :  { %v141_v32 = vadd.f32 %v140_v30, %v63_v27 }
  0xc9   :  { %v144_v33 = vmax.f32 %v141_v32, 0.0 }
  0xcb   :  { %175 = vmatpush.msra.mxu1 %v144_v33 }
  0xcd   :  { %176 = vmatpush.msra.mxu1 %v143_v34 }
  0xce   :  { %400 = vmatmul.msk.f32.vlgmr.msra.gmra.mxu1 %vm65_vm0, %v17_v35 }
  0xd6   :  { %401 = vmatmul.msk.f32.gmra.mxu1 %vm65_vm0, %v18_v36 }
 0x14b   :  { %v178_v40 = vpop.f32.mrf.mxu1 }
 0x14c   :  { %v179_v44 = vadd.f32 %v178_v40, %v148_v42 }
 0x14e   :  { %v184_v47 = vmax.f32 %v179_v44, 0.0 }
 0x153   :  { %v181_v43 = vpop.f32.mrf.mxu1 }
 0x154   :  { %v182_v45 = vadd.f32 %v181_v43, %v153_v38 }
 0x156   :  { %v185_v46 = vmax.f32 %v182_v45, 0.0 }
 0x158   :  { %216 = vmatpush.msra.mxu2 %v185_v46 }
 0x15a   :  { %217 = vmatpush.msra.mxu2 %v184_v47 }
 0x15b   :  { %402 = vmatmul.msk.f32.vlgmr.msra.gmra.mxu2 %vm65_vm0, %v19_v48 }
 0x163   :  { %403 = vmatmul.msk.f32.gmra.mxu2 %vm65_vm0, %v20_v49 }
 0x1de   :  { %v219_v51 = vpop.f32.mrf.mxu2 }
 0x1df   :  { %v220_v54 = vadd.f32 %v219_v51, %v189_v52 }
 0x1e1   :  { %v225_v57 = vmax.f32 %v220_v54, 0.0 }
 0x1e6   :  { %v222_v53 = vpop.f32.mrf.mxu2 }
 0x1e7   :  { %v223_v55 = vadd.f32 %v222_v53, %v194_v50 }
 0x1e9   :  { %v226_v56 = vmax.f32 %v223_v55, 0.0 }
 0x1eb   :  { %257 = vmatpush.msra.mxu3 %v226_v56 }
 0x1ed   :  { %258 = vmatpush.msra.mxu3 %v225_v57 }
 0x1ee   :  { %404 = vmatmul.msk.f32.vlgmr.msra.gmra.mxu3 %vm65_vm0, %v21_v58 }
 0x1f6   :  { %405 = vmatmul.msk.f32.gmra.mxu3 %vm65_vm0, %v22_v59 }
 0x271   :  { %v260_v60 = vpop.f32.mrf.mxu3 }
 0x272   :  { %v261_v0 = vadd.f32 %v260_v60, %v230_v62 }
 0x274   :  { %v266_v3 = vmax.f32 %v261_v0, 0.0 }
 0x279   :  { %v263_v63 = vpop.f32.mrf.mxu3 }
 0x27a   :  { %v264_v1 = vadd.f32 %v263_v63, %v235_v61 }
 0x27c   :  { %v267_v2 = vmax.f32 %v264_v1, 0.0 }
 0x27e   :  { %298 = vmatpush.msrb.mxu1 %v267_v2 }
 0x280   :  { %299 = vmatpush.msrb.mxu1 %v266_v3 }
 0x281   :  { %406 = vmatmul.msk.f32.vlgmr.msrb.gmra.mxu1 %vm65_vm0, %v23_v4 }
 0x289   :  { %407 = vmatmul.msk.f32.gmra.mxu1 %vm65_vm0, %v24_v5 }
 0x2fe   :  { %v301_v6 = vpop.f32.mrf.mxu1 }
 0x2ff   :  { %v302_v10 = vadd.f32 %v301_v6, %v271_v7 }
 0x301   :  { %v307_v13 = vmax.f32 %v302_v10, 0.0 }
 0x306   :  { %v304_v9 = vpop.f32.mrf.mxu1 }
 0x307   :  { %v305_v11 = vadd.f32 %v304_v9, %v276_v8 }
 0x309   :  { %v308_v12 = vmax.f32 %v305_v11, 0.0 }
 0x30b   :  { %338 = vmatpush.msrb.mxu2 %v308_v12 }
 0x30d   :  { %339 = vmatpush.msrb.mxu2 %v307_v13 }
 0x30e   :  { %408 = vmatmul.msk.f32.vlgmr.msrb.gmra.mxu2 %vm65_vm0, %v25_v14 }
 0x316   :  { %409 = vmatmul.msk.f32.gmra.mxu2 %vm65_vm0, %v26_v15 }
 0x391   :  { %v341_v17 = vpop.f32.mrf.mxu2 }
 0x392   :  { %v342_v18 = vadd.f32 %v341_v17, %v312_v16 }
 0x394   :  { %v410_v19 = vmul.f32 -1.442695, %v342_v18 }
 0x396   :  { %416 = vpow2.f32 %v410_v19 }
 0x399   :  { %v344_v20 = vpop.f32.mrf.mxu2 }
 0x39c   :  { %v417_v21 = vpop.eup %416 }
 0x39d   :  { %v349_v22 = vadd.f32 1.0, %v417_v21 }
 0x39f   :  { %418 = vrcp.f32 %v349_v22  ;;  %v361_v26 = vand.u32 2147483648, %v349_v22  ;;  %v359_v28 = vand.u32 2147483647, %v349_v22  ;;  %vm355_vm2 = vweird.f32 %v349_v22 }
 0x3a1   :  { %v362_v30 = vor.u32 1.1754944e-38, %v361_v26  ;;  %vm360_vm4 = vcmp.eq.f32.partialorder %v359_v28, 8.507059e+37 }
 0x3a5   :  { %v419_v23 = vpop.eup %418 }
 0x3a6   :  { %v351_v24 = vmul.f32 %v419_v23, %v349_v22  ;;  %vm356_vm1 = vweird.f32 %v419_v23 }
 0x3a7   :  { %vm357_vm3 = vmor %vm355_vm2, %vm356_vm1 }
 0x3a8   :  { %v352_v25 = vsub.f32 1.0, %v351_v24 }
 0x3aa   :  { %v353_v27 = vmul.f32 %v419_v23, %v352_v25 }
 0x3ac   :  { %v354_v29 = vadd.f32 %v419_v23, %v353_v27 }
 0x3ae   :  { %v358_v31 = vsel %vm357_vm3, %v419_v23, %v354_v29 }
 0x3af   :  { %v363_v32 = vsel %vm360_vm4, %v362_v30, %v358_v31 }
 0x3b0   :  { %365 = vst [vmem:[#allocation2] sm:$0x7] %v363_v32 }
 0x3b1   :  { %376 = dma.vmem_to_hbm [thread:$0]  %s372_s1, 64, %s374_s9, [#allocation3]  }
 0x3b2   :  { %444 = dma.done.wait [#allocation3], 64  }
 0x3b3   :  { %445 = vsyncadd [#allocation3], 4294967232 }
 0x3b4   :  { %381 = vsyncpa [#allocation3], 1 }

</bundles_post_ra>
